<compile_context>
chip_gen: v6e
topology: v6e:2x2x1
jax: 0.10.0
libtpu: 0.0.40
codegen_flags: <defaults>
</compile_context>

<pallas_src>
import functools

import jax
import jax.numpy as jnp
import numpy as np
from jax import lax
from jax.experimental import pallas as pl
from jax.experimental.pallas import tpu as pltpu


def _simclr_loss_kernel(zi_ref, zj_ref, out_ref,
                        acc_ref, cmax_ref, csum_ref,
                        *, normalize, inv_t, tq, inv_2bs):
    """One row-tile step of the NT-Xent loss.

    acc_ref  : (1,1)  running sum of (lse_i - 2*pos) over processed rows.
    cmax_ref : (1,bs) running column max for the "j" half (l_ij cols + masked l_jj cols).
    csum_ref : (1,bs) running column sum of exp(. - cmax) for the "j" half.
    """
    t = pl.program_id(0)
    bs = zi_ref.shape[0]
    NEG = -1e30
    EPS = 1e-12  # torch.nn.functional.normalize eps

    @pl.when(t == 0)
    def _init():
        acc_ref[...] = jnp.zeros_like(acc_ref)
        cmax_ref[...] = jnp.zeros_like(cmax_ref) + NEG
        csum_ref[...] = jnp.zeros_like(csum_ref)

    # ---- full (bs, d) "key" side operands, normalized in f32 ----------------
    zi_f = zi_ref[...].astype(jnp.float32)
    zj_f = zj_ref[...].astype(jnp.float32)
    if normalize:
        zi_f = zi_f / jnp.maximum(
            jnp.sqrt(jnp.sum(zi_f * zi_f, axis=-1, keepdims=True)), EPS)
        zj_f = zj_f / jnp.maximum(
            jnp.sqrt(jnp.sum(zj_f * zj_f, axis=-1, keepdims=True)), EPS)

    # ---- (tq, d) row tile ("query" side) -------------------------------------
    r0 = pl.multiple_of(t * tq, tq)
    zi_t = zi_ref[pl.ds(r0, tq), :].astype(jnp.float32)
    zj_t = zj_ref[pl.ds(r0, tq), :].astype(jnp.float32)
    if normalize:
        zi_t = zi_t / jnp.maximum(
            jnp.sqrt(jnp.sum(zi_t * zi_t, axis=-1, keepdims=True)), EPS)
        zj_t = zj_t / jnp.maximum(
            jnp.sqrt(jnp.sum(zj_t * zj_t, axis=-1, keepdims=True)), EPS)

    # ---- 3 MXU matmuls (l_ji is handled via columns of l_ij) ----------------
    mm_dtype = zi_ref.dtype
    dn = (((1,), (1,)), ((), ()))  # contract last dims: X @ Y.T without transpose
    zi_t_mm = zi_t.astype(mm_dtype)
    zj_t_mm = zj_t.astype(mm_dtype)
    zi_mm = zi_f.astype(mm_dtype)
    zj_mm = zj_f.astype(mm_dtype)

    l_ii = lax.dot_general(zi_t_mm, zi_mm, dn,
                           preferred_element_type=jnp.float32) * inv_t
    l_ij = lax.dot_general(zi_t_mm, zj_mm, dn,
                           preferred_element_type=jnp.float32) * inv_t
    l_jj = lax.dot_general(zj_t_mm, zj_mm, dn,
                           preferred_element_type=jnp.float32) * inv_t

    # ---- diagonal mask (built once, reused for ii and jj) -------------------
    lrow = lax.broadcasted_iota(jnp.int32, (tq, bs), 0)
    col = lax.broadcasted_iota(jnp.int32, (tq, bs), 1)
    diag_neg = (col == (lrow + r0)).astype(jnp.float32) * NEG
    m_ii = l_ii + diag_neg
    m_jj = l_jj + diag_neg

    # ---- positive logits: diag(l_ij) computed directly ----------------------
    pos = jnp.sum(zi_t * zj_t, axis=-1, keepdims=True) * inv_t  # (tq, 1)

    # ---- "i" half: per-row log-sum-exp over {masked ii, ij} -----------------
    row_max = jnp.maximum(jnp.max(m_ii, axis=1, keepdims=True),
                          jnp.max(l_ij, axis=1, keepdims=True))
    row_sum = (jnp.sum(jnp.exp(m_ii - row_max), axis=1, keepdims=True) +
               jnp.sum(jnp.exp(l_ij - row_max), axis=1, keepdims=True))
    lse_i = jnp.log(row_sum) + row_max                            # (tq, 1)

    # pos_j == pos_i elementwise, so subtract 2*pos here and only add lse_j later.
    acc_ref[...] += jnp.sum(lse_i - 2.0 * pos, axis=0, keepdims=True)

    # ---- "j" half: online column LSE over {l_ij columns, masked l_jj columns}
    tcol_max = jnp.maximum(jnp.max(l_ij, axis=0, keepdims=True),
                           jnp.max(m_jj, axis=0, keepdims=True))  # (1, bs)
    new_max = jnp.maximum(cmax_ref[...], tcol_max)
    scale = jnp.exp(cmax_ref[...] - new_max)
    csum_ref[...] = (csum_ref[...] * scale +
                     jnp.sum(jnp.exp(l_ij - new_max), axis=0, keepdims=True) +
                     jnp.sum(jnp.exp(m_jj - new_max), axis=0, keepdims=True))
    cmax_ref[...] = new_max

    # ---- finalize on the last row tile ---------------------------------------
    @pl.when(t == pl.num_programs(0) - 1)
    def _finalize():
        lse_j = jnp.log(csum_ref[...]) + cmax_ref[...]            # (1, bs)
        total = acc_ref[...] + jnp.sum(lse_j, axis=1, keepdims=True)
        out_ref[...] = total * inv_2bs


def _pick_row_tile(bs, row_tile):
    if bs <= row_tile:
        return bs
    for cand in (row_tile, 512, 256, 128, 64, 32, 16, 8):
        if cand <= bs and bs % cand == 0:
            return cand
    return bs  # fallback: full-resident (no row tiling)


def simclr_loss(zi, zj, *, normalize=False, temperature=1.0, row_tile=256):
    """Pallas TPU implementation of SimclrLoss.forward (returns scalar loss)."""
    bs, d = zi.shape
    assert zj.shape == (bs, d)
    tq = _pick_row_tile(bs, row_tile)
    nt = bs // tq

    kernel = functools.partial(
        _simclr_loss_kernel,
        normalize=bool(normalize),
        inv_t=float(1.0 / temperature),
        tq=int(tq),
        inv_2bs=float(1.0 / (2.0 * bs)),
    )

    out = pl.pallas_call(
        kernel,
        grid=(nt,),
        in_specs=[
            pl.BlockSpec((bs, d), lambda t: (0, 0)),   # zi resident (key side)
            pl.BlockSpec((bs, d), lambda t: (0, 0)),   # zj resident (key side)
        ],
        out_specs=pl.BlockSpec((1, 1), lambda t: (0, 0)),
        out_shape=jax.ShapeDtypeStruct((1, 1), jnp.float32),
        scratch_shapes=[
            pltpu.VMEM((1, 1), jnp.float32),    # acc: sum(lse_i - 2*pos)
            pltpu.VMEM((1, bs), jnp.float32),   # running column max (j half)
            pltpu.VMEM((1, bs), jnp.float32),   # running column sum (j half)
        ],
        compiler_params=pltpu.CompilerParams(
            dimension_semantics=("arbitrary",)),  # grid axis carries the reduction
    )(zi, zj)
    return out[0, 0]


def _simclr_loss_ref(zi, zj, *, normalize=False, temperature=1.0):
    """Pure-JAX reference mirroring the PyTorch gather/cat construction."""
    bs = zi.shape[0]
    zi = zi.astype(jnp.float32)
    zj = zj.astype(jnp.float32)
    if normalize:
        zi = zi / jnp.maximum(jnp.linalg.norm(zi, axis=-1, keepdims=True), 1e-12)
        zj = zj / jnp.maximum(jnp.linalg.norm(zj, axis=-1, keepdims=True), 1e-12)
    l_ii = zi @ zi.T / temperature
    l_ij = zi @ zj.T / temperature
    l_ji = zj @ zi.T / temperature
    l_jj = zj @ zj.T / temperature
    mask = ~jnp.eye(bs, dtype=bool)
    off = lambda m: m[mask].reshape(bs, bs - 1)
    pos = jnp.concatenate([jnp.diag(l_ij), jnp.diag(l_ji)])[:, None]
    neg_i = jnp.concatenate([off(l_ii), off(l_ij)], axis=1)
    neg_j = jnp.concatenate([off(l_ji), off(l_jj)], axis=1)
    neg = jnp.concatenate([neg_i, neg_j], axis=0)
    logits = jnp.concatenate([pos, neg], axis=1)
    lse = jax.scipy.special.logsumexp(logits, axis=1)
    return jnp.mean(lse - logits[:, 0])


if __name__ == "__main__":
    key = jax.random.PRNGKey(0)

    # Case 1: small batch, single tile, normalize=True.
    k1, k2, k3, k4 = jax.random.split(key, 4)
    bs, d = 8, 32
    zi = jax.random.normal(k1, (bs, d), dtype=jnp.float32)
    zj = jax.random.normal(k2, (bs, d), dtype=jnp.float32)
    loss1 = jax.block_until_ready(
        simclr_loss(zi, zj, normalize=True, temperature=0.5))
    ref1 = _simclr_loss_ref(zi, zj, normalize=True, temperature=0.5)
    np.testing.assert_allclose(np.asarray(loss1), np.asarray(ref1),
                               rtol=1e-5, atol=1e-5)

    # Case 2: multi-tile grid path (bs=16, row_tile=8 -> 2 grid steps),
    # exercising the online column-LSE accumulation, normalize=False.
    bs2, d2 = 16, 32
    zi2 = jax.random.normal(k3, (bs2, d2), dtype=jnp.float32)
    zj2 = jax.random.normal(k4, (bs2, d2), dtype=jnp.float32)
    loss2 = jax.block_until_ready(
        simclr_loss(zi2, zj2, normalize=False, temperature=1.0, row_tile=8))
    ref2 = _simclr_loss_ref(zi2, zj2, normalize=False, temperature=1.0)
    np.testing.assert_allclose(np.asarray(loss2), np.asarray(ref2),
                               rtol=1e-5, atol=1e-5)

    print("KERNEL_OK")
</pallas_src>

<mosaic_0001>
module attributes {stable_mosaic.version = 11 : i64} {
  func.func @_simclr_loss_kernel(%arg0: i32, %arg1: memref<8x32xf32, #tpu.memory_space<vmem>>, %arg2: memref<8x32xf32, #tpu.memory_space<vmem>>, %arg3: memref<1x1xf32, #tpu.memory_space<vmem>>, %arg4: memref<1x1xf32, #tpu.memory_space<vmem>>, %arg5: memref<1x8xf32, #tpu.memory_space<vmem>>, %arg6: memref<1x8xf32, #tpu.memory_space<vmem>>) attributes {dimension_semantics = [#tpu.dimension_semantics<arbitrary>], iteration_bounds = array<i64: 1>, scalar_prefetch = 0 : i64, scratch_operands = 3 : i64, tpu.core_type = #tpu.core_type<tc>, window_params = [{pipeline_mode = #tpu.pipeline_mode<synchronous>, transform_indices = @transform_0, window_bounds = array<i64: 8, 32>}, {pipeline_mode = #tpu.pipeline_mode<synchronous>, transform_indices = @transform_1, window_bounds = array<i64: 8, 32>}, {pipeline_mode = #tpu.pipeline_mode<synchronous>, transform_indices = @transform_2, window_bounds = array<i64: 1, 1>}]} {
    %c0_i32 = arith.constant 0 : i32
    %0 = arith.cmpi eq, %arg0, %c0_i32 : i32
    %1 = arith.extui %0 : i1 to i32
    %c0_i32_0 = arith.constant 0 : i32
    %2 = arith.cmpi ne, %1, %c0_i32_0 : i32
    scf.if %2 {
      %cst_48 = arith.constant 0.000000e+00 : f32
      %123 = vector.broadcast %cst_48 : f32 to vector<1x1xf32>
      %c0_49 = arith.constant 0 : index
      %c0_50 = arith.constant 0 : index
      %124 = vector.load %arg4[%c0_49, %c0_50] : memref<1x1xf32, #tpu.memory_space<vmem>>, vector<1x1xf32>
      tpu.vector_store %arg4[%c0_49, %c0_50], %123 {strides = array<i32>} : memref<1x1xf32, #tpu.memory_space<vmem>>, vector<1x1xf32>,
      %cst_51 = arith.constant 0.000000e+00 : f32
      %125 = vector.broadcast %cst_51 : f32 to vector<1x8xf32>
      %cst_52 = arith.constant -1.000000e+30 : f32
      %126 = vector.broadcast %cst_52 : f32 to vector<1x8xf32>
      %127 = arith.addf %125, %126 : vector<1x8xf32>
      %c0_53 = arith.constant 0 : index
      %c0_54 = arith.constant 0 : index
      %128 = vector.load %arg5[%c0_53, %c0_54] : memref<1x8xf32, #tpu.memory_space<vmem>>, vector<1x8xf32>
      tpu.vector_store %arg5[%c0_53, %c0_54], %127 {strides = array<i32>} : memref<1x8xf32, #tpu.memory_space<vmem>>, vector<1x8xf32>,
      %cst_55 = arith.constant 0.000000e+00 : f32
      %129 = vector.broadcast %cst_55 : f32 to vector<1x8xf32>
      %c0_56 = arith.constant 0 : index
      %c0_57 = arith.constant 0 : index
      %130 = vector.load %arg6[%c0_56, %c0_57] : memref<1x8xf32, #tpu.memory_space<vmem>>, vector<1x8xf32>
      tpu.vector_store %arg6[%c0_56, %c0_57], %129 {strides = array<i32>} : memref<1x8xf32, #tpu.memory_space<vmem>>, vector<1x8xf32>,
    } else {
    }
    %c0 = arith.constant 0 : index
    %c0_1 = arith.constant 0 : index
    %3 = vector.load %arg1[%c0, %c0_1] : memref<8x32xf32, #tpu.memory_space<vmem>>, vector<8x32xf32>
    %c0_2 = arith.constant 0 : index
    %c0_3 = arith.constant 0 : index
    %4 = vector.load %arg2[%c0_2, %c0_3] : memref<8x32xf32, #tpu.memory_space<vmem>>, vector<8x32xf32>
    %5 = arith.mulf %3, %3 : vector<8x32xf32>
    %cst = arith.constant dense<0.000000e+00> : vector<8xf32>
    %6 = vector.multi_reduction <add>, %5, %cst [1] : vector<8x32xf32> to vector<8xf32>
    %7 = vector.shape_cast %6 : vector<8xf32> to vector<8x1xf32>
    %8 = math.sqrt %7 : vector<8x1xf32>
    %cst_4 = arith.constant 9.99999996E-13 : f32
    %9 = vector.broadcast %cst_4 : f32 to vector<8x1xf32>
    %10 = arith.maximumf %8, %9 : vector<8x1xf32>
    %11 = vector.broadcast %10 : vector<8x1xf32> to vector<8x32xf32>
    %12 = arith.divf %3, %11 : vector<8x32xf32>
    %13 = arith.mulf %4, %4 : vector<8x32xf32>
    %cst_5 = arith.constant dense<0.000000e+00> : vector<8xf32>
    %14 = vector.multi_reduction <add>, %13, %cst_5 [1] : vector<8x32xf32> to vector<8xf32>
    %15 = vector.shape_cast %14 : vector<8xf32> to vector<8x1xf32>
    %16 = math.sqrt %15 : vector<8x1xf32>
    %cst_6 = arith.constant 9.99999996E-13 : f32
    %17 = vector.broadcast %cst_6 : f32 to vector<8x1xf32>
    %18 = arith.maximumf %16, %17 : vector<8x1xf32>
    %19 = vector.broadcast %18 : vector<8x1xf32> to vector<8x32xf32>
    %20 = arith.divf %4, %19 : vector<8x32xf32>
    %c8_i32 = arith.constant 8 : i32
    %21 = arith.muli %arg0, %c8_i32 : i32
    %22 = tpu.assume_multiple %21, 8 : i32
    %23 = arith.index_cast %22 : i32 to index
    %c0_7 = arith.constant 0 : index
    %24 = vector.load %arg1[%23, %c0_7] : memref<8x32xf32, #tpu.memory_space<vmem>>, vector<8x32xf32>
    %25 = arith.index_cast %22 : i32 to index
    %c0_8 = arith.constant 0 : index
    %26 = vector.load %arg2[%25, %c0_8] : memref<8x32xf32, #tpu.memory_space<vmem>>, vector<8x32xf32>
    %27 = arith.mulf %24, %24 : vector<8x32xf32>
    %cst_9 = arith.constant dense<0.000000e+00> : vector<8xf32>
    %28 = vector.multi_reduction <add>, %27, %cst_9 [1] : vector<8x32xf32> to vector<8xf32>
    %29 = vector.shape_cast %28 : vector<8xf32> to vector<8x1xf32>
    %30 = math.sqrt %29 : vector<8x1xf32>
    %cst_10 = arith.constant 9.99999996E-13 : f32
    %31 = vector.broadcast %cst_10 : f32 to vector<8x1xf32>
    %32 = arith.maximumf %30, %31 : vector<8x1xf32>
    %33 = vector.broadcast %32 : vector<8x1xf32> to vector<8x32xf32>
    %34 = arith.divf %24, %33 : vector<8x32xf32>
    %35 = arith.mulf %26, %26 : vector<8x32xf32>
    %cst_11 = arith.constant dense<0.000000e+00> : vector<8xf32>
    %36 = vector.multi_reduction <add>, %35, %cst_11 [1] : vector<8x32xf32> to vector<8xf32>
    %37 = vector.shape_cast %36 : vector<8xf32> to vector<8x1xf32>
    %38 = math.sqrt %37 : vector<8x1xf32>
    %cst_12 = arith.constant 9.99999996E-13 : f32
    %39 = vector.broadcast %cst_12 : f32 to vector<8x1xf32>
    %40 = arith.maximumf %38, %39 : vector<8x1xf32>
    %41 = vector.broadcast %40 : vector<8x1xf32> to vector<8x32xf32>
    %42 = arith.divf %26, %41 : vector<8x32xf32>
    %cst_13 = arith.constant dense<0.000000e+00> : vector<8x8xf32>
    %43 = tpu.matmul %34, %12, %cst_13 {dimension_numbers = #tpu.dot_dimension_numbers<[1], [1], [0], [0], [0, 0, 1, 0], [], []>} : vector<8x32xf32>, vector<8x32xf32>, vector<8x8xf32> -> vector<8x8xf32>
    %cst_14 = arith.constant 2.000000e+00 : f32
    %44 = vector.broadcast %cst_14 : f32 to vector<8x8xf32>
    %45 = arith.mulf %43, %44 : vector<8x8xf32>
    %cst_15 = arith.constant dense<0.000000e+00> : vector<8x8xf32>
    %46 = tpu.matmul %34, %20, %cst_15 {dimension_numbers = #tpu.dot_dimension_numbers<[1], [1], [0], [0], [0, 0, 1, 0], [], []>} : vector<8x32xf32>, vector<8x32xf32>, vector<8x8xf32> -> vector<8x8xf32>
    %cst_16 = arith.constant 2.000000e+00 : f32
    %47 = vector.broadcast %cst_16 : f32 to vector<8x8xf32>
    %48 = arith.mulf %46, %47 : vector<8x8xf32>
    %cst_17 = arith.constant dense<0.000000e+00> : vector<8x8xf32>
    %49 = tpu.matmul %42, %20, %cst_17 {dimension_numbers = #tpu.dot_dimension_numbers<[1], [1], [0], [0], [0, 0, 1, 0], [], []>} : vector<8x32xf32>, vector<8x32xf32>, vector<8x8xf32> -> vector<8x8xf32>
    %cst_18 = arith.constant 2.000000e+00 : f32
    %50 = vector.broadcast %cst_18 : f32 to vector<8x8xf32>
    %51 = arith.mulf %49, %50 : vector<8x8xf32>
    %52 = tpu.iota {dimensions = array<i32: 0>} : vector<8x8xi32>
    %53 = tpu.iota {dimensions = array<i32: 1>} : vector<8x8xi32>
    %54 = vector.broadcast %22 : i32 to vector<8x8xi32>
    %55 = arith.addi %52, %54 : vector<8x8xi32>
    %56 = arith.cmpi eq, %53, %55 : vector<8x8xi32>
    %57 = arith.extui %56 : vector<8x8xi1> to vector<8x8xi32>
    %58 = arith.sitofp %57 : vector<8x8xi32> to vector<8x8xf32>
    %cst_19 = arith.constant -1.000000e+30 : f32
    %59 = vector.broadcast %cst_19 : f32 to vector<8x8xf32>
    %60 = arith.mulf %58, %59 : vector<8x8xf32>
    %61 = arith.addf %45, %60 : vector<8x8xf32>
    %62 = arith.addf %51, %60 : vector<8x8xf32>
    %63 = arith.mulf %34, %42 : vector<8x32xf32>
    %cst_20 = arith.constant dense<0.000000e+00> : vector<8xf32>
    %64 = vector.multi_reduction <add>, %63, %cst_20 [1] : vector<8x32xf32> to vector<8xf32>
    %65 = vector.shape_cast %64 : vector<8xf32> to vector<8x1xf32>
    %cst_21 = arith.constant 2.000000e+00 : f32
    %66 = vector.broadcast %cst_21 : f32 to vector<8x1xf32>
    %67 = arith.mulf %65, %66 : vector<8x1xf32>
    %cst_22 = arith.constant dense<0xFF800000> : vector<8xf32>
    %68 = vector.multi_reduction <maximumf>, %61, %cst_22 [1] : vector<8x8xf32> to vector<8xf32>
    %69 = vector.shape_cast %68 : vector<8xf32> to vector<8x1xf32>
    %cst_23 = arith.constant dense<0xFF800000> : vector<8xf32>
    %70 = vector.multi_reduction <maximumf>, %48, %cst_23 [1] : vector<8x8xf32> to vector<8xf32>
    %71 = vector.shape_cast %70 : vector<8xf32> to vector<8x1xf32>
    %72 = arith.maximumf %69, %71 : vector<8x1xf32>
    %73 = vector.broadcast %72 : vector<8x1xf32> to vector<8x8xf32>
    %74 = arith.subf %61, %73 : vector<8x8xf32>
    %75 = math.exp %74 : vector<8x8xf32>
    %cst_24 = arith.constant dense<0.000000e+00> : vector<8xf32>
    %76 = vector.multi_reduction <add>, %75, %cst_24 [1] : vector<8x8xf32> to vector<8xf32>
    %77 = vector.shape_cast %76 : vector<8xf32> to vector<8x1xf32>
    %78 = vector.broadcast %72 : vector<8x1xf32> to vector<8x8xf32>
    %79 = arith.subf %48, %78 : vector<8x8xf32>
    %80 = math.exp %79 : vector<8x8xf32>
    %cst_25 = arith.constant dense<0.000000e+00> : vector<8xf32>
    %81 = vector.multi_reduction <add>, %80, %cst_25 [1] : vector<8x8xf32> to vector<8xf32>
    %82 = vector.shape_cast %81 : vector<8xf32> to vector<8x1xf32>
    %83 = arith.addf %77, %82 : vector<8x1xf32>
    %84 = math.log %83 : vector<8x1xf32>
    %85 = arith.addf %84, %72 : vector<8x1xf32>
    %c0_26 = arith.constant 0 : index
    %c0_27 = arith.constant 0 : index
    %86 = vector.load %arg4[%c0_26, %c0_27] : memref<1x1xf32, #tpu.memory_space<vmem>>, vector<1x1xf32>
    %cst_28 = arith.constant 2.000000e+00 : f32
    %87 = vector.broadcast %cst_28 : f32 to vector<8x1xf32>
    %88 = arith.mulf %87, %67 : vector<8x1xf32>
    %89 = arith.subf %85, %88 : vector<8x1xf32>
    %cst_29 = arith.constant dense<0.000000e+00> : vector<1xf32>
    %90 = vector.multi_reduction <add>, %89, %cst_29 [0] : vector<8x1xf32> to vector<1xf32>
    %91 = vector.shape_cast %90 : vector<1xf32> to vector<1x1xf32>
    %92 = arith.addf %86, %91 : vector<1x1xf32>
    %c0_30 = arith.constant 0 : index
    %c0_31 = arith.constant 0 : index
    %93 = vector.load %arg4[%c0_30, %c0_31] : memref<1x1xf32, #tpu.memory_space<vmem>>, vector<1x1xf32>
    tpu.vector_store %arg4[%c0_30, %c0_31], %92 {strides = array<i32>} : memref<1x1xf32, #tpu.memory_space<vmem>>, vector<1x1xf32>,
    %cst_32 = arith.constant dense<0xFF800000> : vector<8xf32>
    %94 = vector.multi_reduction <maximumf>, %48, %cst_32 [0] : vector<8x8xf32> to vector<8xf32>
    %95 = vector.shape_cast %94 : vector<8xf32> to vector<1x8xf32>
    %cst_33 = arith.constant dense<0xFF800000> : vector<8xf32>
    %96 = vector.multi_reduction <maximumf>, %62, %cst_33 [0] : vector<8x8xf32> to vector<8xf32>
    %97 = vector.shape_cast %96 : vector<8xf32> to vector<1x8xf32>
    %98 = arith.maximumf %95, %97 : vector<1x8xf32>
    %c0_34 = arith.constant 0 : index
    %c0_35 = arith.constant 0 : index
    %99 = vector.load %arg5[%c0_34, %c0_35] : memref<1x8xf32, #tpu.memory_space<vmem>>, vector<1x8xf32>
    %100 = arith.maximumf %99, %98 : vector<1x8xf32>
    %c0_36 = arith.constant 0 : index
    %c0_37 = arith.constant 0 : index
    %101 = vector.load %arg5[%c0_36, %c0_37] : memref<1x8xf32, #tpu.memory_space<vmem>>, vector<1x8xf32>
    %102 = arith.subf %101, %100 : vector<1x8xf32>
    %103 = math.exp %102 : vector<1x8xf32>
    %c0_38 = arith.constant 0 : index
    %c0_39 = arith.constant 0 : index
    %104 = vector.load %arg6[%c0_38, %c0_39] : memref<1x8xf32, #tpu.memory_space<vmem>>, vector<1x8xf32>
    %105 = arith.mulf %104, %103 : vector<1x8xf32>
    %106 = vector.broadcast %100 : vector<1x8xf32> to vector<8x8xf32>
    %107 = arith.subf %48, %106 : vector<8x8xf32>
    %108 = math.exp %107 : vector<8x8xf32>
    %cst_40 = arith.constant dense<0.000000e+00> : vector<8xf32>
    %109 = vector.multi_reduction <add>, %108, %cst_40 [0] : vector<8x8xf32> to vector<8xf32>
    %110 = vector.shape_cast %109 : vector<8xf32> to vector<1x8xf32>
    %111 = arith.addf %105, %110 : vector<1x8xf32>
    %112 = vector.broadcast %100 : vector<1x8xf32> to vector<8x8xf32>
    %113 = arith.subf %62, %112 : vector<8x8xf32>
    %114 = math.exp %113 : vector<8x8xf32>
    %cst_41 = arith.constant dense<0.000000e+00> : vector<8xf32>
    %115 = vector.multi_reduction <add>, %114, %cst_41 [0] : vector<8x8xf32> to vector<8xf32>
    %116 = vector.shape_cast %115 : vector<8xf32> to vector<1x8xf32>
    %117 = arith.addf %111, %116 : vector<1x8xf32>
    %c0_42 = arith.constant 0 : index
    %c0_43 = arith.constant 0 : index
    %118 = vector.load %arg6[%c0_42, %c0_43] : memref<1x8xf32, #tpu.memory_space<vmem>>, vector<1x8xf32>
    tpu.vector_store %arg6[%c0_42, %c0_43], %117 {strides = array<i32>} : memref<1x8xf32, #tpu.memory_space<vmem>>, vector<1x8xf32>,
    %c0_44 = arith.constant 0 : index
    %c0_45 = arith.constant 0 : index
    %119 = vector.load %arg5[%c0_44, %c0_45] : memref<1x8xf32, #tpu.memory_space<vmem>>, vector<1x8xf32>
    tpu.vector_store %arg5[%c0_44, %c0_45], %100 {strides = array<i32>} : memref<1x8xf32, #tpu.memory_space<vmem>>, vector<1x8xf32>,
    %c0_i32_46 = arith.constant 0 : i32
    %120 = arith.cmpi eq, %arg0, %c0_i32_46 : i32
    %121 = arith.extui %120 : i1 to i32
    %c0_i32_47 = arith.constant 0 : i32
    %122 = arith.cmpi ne, %121, %c0_i32_47 : i32
    scf.if %122 {
      %c0_48 = arith.constant 0 : index
      %c0_49 = arith.constant 0 : index
      %123 = vector.load %arg6[%c0_48, %c0_49] : memref<1x8xf32, #tpu.memory_space<vmem>>, vector<1x8xf32>
      %124 = math.log %123 : vector<1x8xf32>
      %c0_50 = arith.constant 0 : index
      %c0_51 = arith.constant 0 : index
      %125 = vector.load %arg5[%c0_50, %c0_51] : memref<1x8xf32, #tpu.memory_space<vmem>>, vector<1x8xf32>
      %126 = arith.addf %124, %125 : vector<1x8xf32>
      %c0_52 = arith.constant 0 : index
      %c0_53 = arith.constant 0 : index
      %127 = vector.load %arg4[%c0_52, %c0_53] : memref<1x1xf32, #tpu.memory_space<vmem>>, vector<1x1xf32>
      %cst_54 = arith.constant dense<0.000000e+00> : vector<1xf32>
      %128 = vector.multi_reduction <add>, %126, %cst_54 [1] : vector<1x8xf32> to vector<1xf32>
      %129 = vector.shape_cast %128 : vector<1xf32> to vector<1x1xf32>
      %130 = arith.addf %127, %129 : vector<1x1xf32>
      %cst_55 = arith.constant 6.250000e-02 : f32
      %131 = vector.broadcast %cst_55 : f32 to vector<1x1xf32>
      %132 = arith.mulf %130, %131 : vector<1x1xf32>
      %c0_56 = arith.constant 0 : index
      %c0_57 = arith.constant 0 : index
      %133 = vector.load %arg3[%c0_56, %c0_57] : memref<1x1xf32, #tpu.memory_space<vmem>>, vector<1x1xf32>
      tpu.vector_store %arg3[%c0_56, %c0_57], %132 {strides = array<i32>} : memref<1x1xf32, #tpu.memory_space<vmem>>, vector<1x1xf32>,
    } else {
    }
    return
  }
  func.func @transform_0(%arg0: i32) -> (i32, i32) {
    %c0_i32 = arith.constant 0 : i32
    %c0_i32_0 = arith.constant 0 : i32
    %c0_i32_1 = arith.constant 0 : i32
    return %c0_i32, %c0_i32_0 : i32, i32
  }
  func.func @transform_1(%arg0: i32) -> (i32, i32) {
    %c0_i32 = arith.constant 0 : i32
    %c0_i32_0 = arith.constant 0 : i32
    %c0_i32_1 = arith.constant 0 : i32
    return %c0_i32, %c0_i32_0 : i32, i32
  }
  func.func @transform_2(%arg0: i32) -> (i32, i32) {
    %c0_i32 = arith.constant 0 : i32
    %c0_i32_0 = arith.constant 0 : i32
    %c0_i32_1 = arith.constant 0 : i32
    return %c0_i32, %c0_i32_0 : i32, i32
  }
}

</mosaic_0001>

<bundles_post_ra>
// kernel: tpu_custom_call.1
= control target key start
LH: loop header
LB: loop body
LE: loop exit
PB: predicated region body
PF: predicated region fallthrough
CT: control target
= control target key end

     0   :  { %7 = vsyncpa [#allocation6], 0  ;;  %s690_s0 = inlined_call_operand.hbm [shape: f32[8,32], index: 0, kind: input, shape index: {}]   ;;  %s691_s1 = inlined_call_operand.hbm [shape: f32[8,32], index: 1, kind: input, shape index: {}]   ;;  %s692_s2 = inlined_call_operand.hbm [shape: f32[1,1], index: 2, kind: output, shape index: {}]  }
   0x1   :  { %8 = vsyncpa [#allocation9], 0 }
   0x2   :  { %9 = vsyncpa [#allocation7], 0  ;;  %s600_s9 = smov [#allocation5]   ;;  %s601_s11 = smov [#allocation8]  }
   0x3   :  { %s16_s10 = sshll.u32 %s600_s9, 4  ;;  %s26_s12 = sshll.u32 %s601_s11, 4  ;;  %s17_s10 = int_to_ptr.vmem [resolvable:$true] %s16_s10  ;;  %s27_s12 = int_to_ptr.vmem [resolvable:$true] %s26_s12 }
   0x4   :  { %s542_s13 = scalar_lea.vmem %s17_s10, 128  ;;  %p547_p1 = scmp.lt.s32.totalorder %s17_s10, %s17_s10 }
   0x5   :  { %p543_p0 = scmp.ne.s32.totalorder %s17_s10, %s542_s13  ;;  %p548_p2 = scmp.lt.s32.totalorder %s542_s13, %s542_s13 }
   0x7   :  { %p549_p3 = por %p548_p2, %p547_p1 }
   0x9   :  { %p550_p4 = pnand %p549_p3, %p543_p0 }
   0xb   :  { %553 = shalt.err (!%p550_p4)
}
   0xc   :  { %19 = dma.hbm_to_vmem [thread:$0]  %s690_s0, 128, %s17_s10, [#allocation6]  }
   0xd   :  { %s562_s16 = scalar_lea.vmem %s27_s12, 128  ;;  %p567_p6 = scmp.lt.s32.totalorder %s27_s12, %s27_s12 }
   0xe   :  { %p563_p5 = scmp.ne.s32.totalorder %s27_s12, %s562_s16  ;;  %p568_p7 = scmp.lt.s32.totalorder %s562_s16, %s562_s16 }
  0x10   :  { %p569_p8 = por %p568_p7, %p567_p6 }
  0x12   :  { %p570_p9 = pnand %p569_p8, %p563_p5 }
  0x14   :  { %573 = shalt.err (!%p570_p9)
}
  0x15   :  { %29 = dma.hbm_to_vmem [thread:$0]  %s691_s1, 128, %s27_s12, [#allocation9]  }
  0x16   :  { %594 = dma.done.wait [#allocation6], 128  }
  0x17   :  { %595 = vsyncadd [#allocation6], 4294967168 }
  0x18   :  { %596 = dma.done.wait [#allocation9], 128  }
  0x19   :  { %597 = vsyncadd [#allocation9], 4294967168  ;;  %vm48_vm0 = vcmask 261120   ;;  %v627_v0 = vld [vmem:[#allocation5] sm:$0xff]  ;;  %v629_v1 = vld [vmem:[#allocation8] sm:$0xff]  ;;  %v602_v6 = vmov 0.0   ;;  %v334_v45 = vlaneseq }
  0x1a   :  { %v81_v2 = vmul.f32 %v627_v0, %v627_v0  ;;  %v95_v3 = vmul.f32 %v629_v1, %v629_v1  ;;  %483 = vmatprep.subr.mxu0 %v602_v6  ;;  %488 = vmatprep.subr.mxu1 %v602_v6  ;;  %vm603_vm1 = vmmov 0   ;;  %vm42_vm10 = vcmask 57344   ;;  %s605_s0 = smov [#allocation10]  }
  0x1b   :  { %485 = vmatprep.mubr.msk.f32.mxu0 %vm603_vm1, %v602_v6  ;;  %490 = vmatprep.mubr.msk.f32.mxu1 %vm603_vm1, %v602_v6  ;;  %v604_v44 = vmov -1e+30   ;;  %44 = vst.msk [vmem:[#allocation4] sm:$0x1] %vm42_vm10, %v602_v6  ;;  %v335_v46 = vshrl.u32 %v334_v45, 7  ;;  %v337_v47 = vand.u32 127, %v334_v45 }
  0x1c   :  { %v82_v4 = vsel %vm48_vm0, %v81_v2, 0.0  ;;  %v96_v5 = vsel %vm48_vm0, %v95_v3, 0.0  ;;  %43 = vst.msk [vmem:[#allocation3] sm:$0x1] %vm42_vm10, %v604_v44  ;;  %vm351_vm12 = vcmask 64512   ;;  %vm40_vm13 = vcmask 0  }
  0x1d   :  { %83 = vadd.xlane.f32.xlu1 %v82_v4  ;;  %50 = vadd.xlane.f32.xlu0 %v82_v4  ;;  %vm340_vm11 = vcmp.eq.s32.totalorder %v337_v47, %v335_v46  ;;  %41 = vst.msk [vmem:[#allocation2] sm:$0x1] %vm40_vm13, %v602_v6  ;;  %s460_s1 = sshll.u32 %s605_s0, 4  ;;  %s461_s1 = int_to_ptr.vmem [resolvable:$true] %s460_s1 }
  0x1e   :  { %v476_v48 = vsel %vm340_vm11, 1.0, %v602_v6  ;;  %s574_s19 = scalar_lea.vmem %s461_s1, 16  ;;  %s578_s20 = scalar_lea.vmem %s461_s1, 32 }
  0x1f   :  { %v343_v49 = vmul.f32 -1e+30, %v476_v48  ;;  %p575_p10 = scmp.ne.s32.totalorder %s461_s1, %s574_s19  ;;  %p579_p11 = scmp.lt.s32.totalorder %s461_s1, %s461_s1 }
  0x20   :  { %p580_p12 = scmp.lt.s32.totalorder %s578_s20, %s574_s19 }
  0x21   :  { %97 = vadd.xlane.f32.xlu1 %v96_v5  ;;  %64 = vadd.xlane.f32.xlu0 %v96_v5 }
  0x22   :  { %p581_p13 = por %p580_p12, %p579_p11 }
  0x24   :  { %p582_p0 = pnand %p581_p13, %p575_p10 }
  0xa6   :  { %v84_v7 = vpop.xlane.xlu1 %83  ;;  %v51_v8 = vpop.xlane.xlu0 %50 }
  0xa7   :  { %504 = vrsqrt.f32 %v84_v7  ;;  %vm87_vm2 = vcmp.eq.f32.partialorder %v84_v7, inf  ;;  %vm89_vm3 = vcmp.eq.f32.partialorder %v84_v7, 0.0  ;;  %v90_v14 = vand.u32 2147483648, %v84_v7 }
  0xa8   :  { %506 = vrsqrt.f32 %v51_v8  ;;  %vm54_vm4 = vcmp.eq.f32.partialorder %v51_v8, inf  ;;  %vm56_vm5 = vcmp.eq.f32.partialorder %v51_v8, 0.0  ;;  %v57_v17 = vand.u32 2147483648, %v51_v8 }
  0xaa   :  { %v98_v9 = vpop.xlane.xlu1 %97  ;;  %v65_v10 = vpop.xlane.xlu0 %64 }
  0xab   :  { %508 = vrsqrt.f32 %v98_v9  ;;  %vm101_vm6 = vcmp.eq.f32.partialorder %v98_v9, inf  ;;  %v104_v21 = vand.u32 2147483648, %v98_v9  ;;  %vm103_vm7 = vcmp.eq.f32.partialorder %v98_v9, 0.0 }
  0xac   :  { %510 = vrsqrt.f32 %v65_v10  ;;  %vm68_vm8 = vcmp.eq.f32.partialorder %v65_v10, inf  ;;  %v71_v29 = vand.u32 2147483648, %v65_v10  ;;  %vm70_vm9 = vcmp.eq.f32.partialorder %v65_v10, 0.0 }
  0xb4   :  { %v505_v11 = vpop.eup %504 }
  0xb5   :  { %v507_v12 = vpop.eup %506  ;;  %v86_v13 = vmul.f32 %v505_v11, %v84_v7 }
  0xb6   :  { %v53_v15 = vmul.f32 %v507_v12, %v51_v8 }
  0xb7   :  { %v88_v16 = vsel %vm87_vm2, %v84_v7, %v86_v13  ;;  %v401_v13 = vld [vmem:[#allocation3] sm:$0x1] }
  0xb8   :  { %v509_v18 = vpop.eup %508  ;;  %v91_v19 = vsel %vm89_vm3, %v90_v14, %v88_v16  ;;  %v55_v20 = vsel %vm54_vm4, %v51_v8, %v53_v15  ;;  %v411_v14 = vsub.s32 0, %v335_v46 }
  0xb9   :  { %v511_v22 = vpop.eup %510  ;;  %v92_v23 = vmax.f32 %v91_v19, 1e-12  ;;  %v58_v24 = vsel %vm56_vm5, %v57_v17, %v55_v20  ;;  %v100_v25 = vmul.f32 %v509_v18, %v98_v9 }
  0xba   :  { %v59_v26 = vmax.f32 %v58_v24, 1e-12  ;;  %v67_v27 = vmul.f32 %v511_v22, %v65_v10 }
  0xbb   :  { %v102_v28 = vsel %vm101_vm6, %v98_v9, %v100_v25 }
  0xbc   :  { %512 = vrcp.f32 %v59_v26  ;;  %v105_v30 = vsel %vm103_vm7, %v104_v21, %v102_v28  ;;  %v69_v31 = vsel %vm68_vm8, %v65_v10, %v67_v27 }
  0xbd   :  { %514 = vrcp.f32 %v92_v23  ;;  %v106_v32 = vmax.f32 %v105_v30, 1e-12  ;;  %v72_v33 = vsel %vm70_vm9, %v71_v29, %v69_v31 }
  0xbe   :  { %v73_v34 = vmax.f32 %v72_v33, 1e-12 }
  0xbf   :  { %516 = vrcp.f32 %v106_v32 }
  0xc0   :  { %518 = vrcp.f32 %v73_v34 }
  0xc9   :  { %v513_v35 = vpop.eup %512 }
  0xca   :  { %v515_v36 = vpop.eup %514  ;;  %v61_v37 = vmul.f32 %v513_v35, %v627_v0 }
  0xcb   :  { %v94_v40 = vmul.f32 %v515_v36, %v627_v0  ;;  %v406_v36 = vld [vmem:[#allocation4] sm:$0x1] }
  0xcc   :  { %v517_v38 = vpop.eup %516  ;;  %484 = vmatpush3.xpose.msk.msra.mxu0 %vm48_vm0, %v61_v37 }
  0xcd   :  { %v519_v39 = vpop.eup %518  ;;  %493 = vmatprep.subr.mxu0 %v602_v6  ;;  %v108_v41 = vmul.f32 %v517_v38, %v629_v1 }
  0xce   :  { %v75_v42 = vmul.f32 %v519_v39, %v629_v1 }
  0xcf   :  { %486 = vmatmul.mubr.msk.f32.vlgmr.msra.gmra.mxu0 %vm48_vm0, %v94_v40  ;;  %v650_v43 = vmul.f32 %v108_v41, %v94_v40 }
  0xd0   :  { %489 = vmatpush3.xpose.msk.msra.mxu1 %vm48_vm0, %v75_v42  ;;  %494 = vmatpush3.xpose.msk.msra.mxu0 %vm48_vm0, %v75_v42 }
  0xd1   :  { %495 = vmatprep.mubr.msk.f32.mxu0 %vm603_vm1, %v602_v6 }
  0xd3   :  { %491 = vmatmul.mubr.msk.f32.vlgmr.msra.gmra.mxu1 %vm48_vm0, %v94_v40  ;;  %496 = vmatmul.mubr.msk.f32.vlgmr.msra.gmra.mxu0 %vm48_vm0, %v108_v41 }
 0x18f   :  { %v181_v50 = vpop.f32.mrf.mxu0 }
 0x190   :  { %v185_v51 = vmul.f32 2.0, %v181_v50 }
 0x191   :  { %v487_v52 = vpop.f32.mrf.mxu0 }
 0x192   :  { %v662_v53 = vadd.f32 %v343_v49, %v185_v51 }
 0x193   :  { %v255_v54 = vpop.f32.mrf.mxu1  ;;  %v329_v55 = vpop.f32.mrf.mxu0 }
 0x194   :  { %v664_v56 = vmul.f32 2.0, %v255_v54  ;;  %v333_v57 = vmul.f32 2.0, %v329_v55  ;;  %v352_v58 = vsel %vm351_vm12, %v662_v53, -inf }
 0x195   :  { %353 = vmax.xlane.f32.xlu0 %v352_v58  ;;  %v492_v59 = vpop.f32.mrf.mxu1  ;;  %v497_v60 = vpop.f32.mrf.mxu0 }
 0x196   :  { %v345_v61 = vadd.f32 %v343_v49, %v333_v57  ;;  %v355_v62 = vsel %vm351_vm12, %v664_v56, -inf }
 0x197   :  { %356 = vmax.xlane.f32.xlu1 %v355_v62  ;;  %v387_v63 = vrot.slane %v355_v62, 4 }
 0x198   :  { %v393_v0 = vsel %vm351_vm12, %v345_v61, -inf }
 0x199   :  { %v394_v1 = vrot.slane %v393_v0, 4  ;;  %v388_v2 = vmax.f32 %v355_v62, %v387_v63 }
 0x19b   :  { %v395_v3 = vmax.f32 %v393_v0, %v394_v1  ;;  %v389_v4 = vrot.slane %v388_v2, 2 }
 0x19d   :  { %v396_v5 = vrot.slane %v395_v3, 2  ;;  %v390_v7 = vmax.f32 %v388_v2, %v389_v4 }
 0x19f   :  { %v397_v8 = vmax.f32 %v395_v3, %v396_v5  ;;  %v391_v9 = vrot.slane %v390_v7, 1 }
 0x1a1   :  { %v398_v10 = vrot.slane %v397_v8, 1  ;;  %v392_v12 = vmax.f32 %v390_v7, %v391_v9 }
 0x1a3   :  { %v399_v11 = vmax.f32 %v397_v8, %v398_v10 }
 0x1a5   :  { %v400_v15 = vmax.f32 %v392_v12, %v399_v11 }
 0x1a7   :  { %v402_v16 = vmax.f32 %v401_v13, %v400_v15  ;;  %v375_v15 = vld [vmem:[#allocation2] sm:$0x1] }
 0x1a9   :  { %v412_v17 = vrot.slane %v402_v16, %v411_v14  ;;  %438 = vst.msk [vmem:[#allocation3] sm:$0x1] %vm42_vm10, %v402_v16  ;;  %v403_v22 = vsub.f32 %v401_v13, %v402_v16 }
 0x1ab   :  { %v414_v18 = vsub.f32 %v664_v56, %v412_v17  ;;  %v425_v19 = vsub.f32 %v345_v61, %v412_v17  ;;  %v404_v23 = vmul.f32 1.442695, %v403_v22 }
 0x1ad   :  { %v415_v20 = vmul.f32 1.442695, %v414_v18  ;;  %v426_v21 = vmul.f32 1.442695, %v425_v19 }
 0x1af   :  { %520 = vpow2.f32 %v415_v20 }
 0x1b0   :  { %522 = vpow2.f32 %v426_v21  ;;  %v445_v61 = vld [vmem:[#allocation3] sm:$0x1] }
 0x1b1   :  { %524 = vpow2.f32 %v404_v23 }
 0x1bc   :  { %v521_v24 = vpop.eup %520 }
 0x1bd   :  { %v523_v25 = vpop.eup %522  ;;  %v417_v26 = vsel %vm351_vm12, %v521_v24, 0.0 }
 0x1be   :  { %v418_v27 = vrot.slane %v417_v26, 4  ;;  %v428_v28 = vsel %vm351_vm12, %v523_v25, 0.0  ;;  %v525_v35 = vpop.eup %524 }
 0x1bf   :  { %v429_v29 = vrot.slane %v428_v28, 4  ;;  %v407_v40 = vmul.f32 %v525_v35, %v406_v36 }
 0x1c0   :  { %v419_v30 = vadd.f32 %v418_v27, %v417_v26 }
 0x1c1   :  { %v430_v31 = vadd.f32 %v429_v29, %v428_v28 }
 0x1c2   :  { %v420_v32 = vrot.slane %v419_v30, 2 }
 0x1c3   :  { %v431_v33 = vrot.slane %v430_v31, 2 }
 0x1c4   :  { %v421_v34 = vadd.f32 %v420_v32, %v419_v30 }
 0x1c5   :  { %v432_v37 = vadd.f32 %v431_v33, %v430_v31 }
 0x1c6   :  { %v422_v38 = vrot.slane %v421_v34, 1 }
 0x1c7   :  { %v433_v39 = vrot.slane %v432_v37, 1 }
 0x1c8   :  { %v423_v41 = vadd.f32 %v422_v38, %v421_v34 }
 0x1c9   :  { %v434_v44 = vadd.f32 %v433_v39, %v432_v37 }
 0x1ca   :  { %v424_v42 = vadd.f32 %v423_v41, %v407_v40 }
 0x1cc   :  { %v435_v45 = vadd.f32 %v434_v44, %v424_v42 }
 0x1ce   :  { %437 = vst.msk [vmem:[#allocation4] sm:$0x1] %vm42_vm10, %v435_v45 }
 0x1d5   :  { %v442_v46 = vld [vmem:[#allocation4] sm:$0x1] }
 0x1d6   :  { %526 = vlog2.f32 %v442_v46 }
 0x1e3   :  { %v527_v55 = vpop.eup %526 }
 0x1e4   :  { %v444_v57 = vmul.f32 0.6931472, %v527_v55 }
 0x1e6   :  { %v446_v63 = vadd.f32 %v445_v61, %v444_v57 }
 0x21e   :  { %v354_v47 = vpop.xlane.xlu0 %353 }
 0x220   :  { %v357_v48 = vpop.xlane.xlu1 %356 }
 0x221   :  { %v358_v49 = vmax.f32 %v354_v47, %v357_v48 }
 0x223   :  { %v359_v50 = vsub.f32 %v662_v53, %v358_v49  ;;  %v365_v51 = vsub.f32 %v664_v56, %v358_v49  ;;  %v347_v53 = vsel %vm48_vm0, %v650_v43, 0.0  ;;  %v448_v56 = vsel %vm42_vm10, %v446_v63, 0.0 }
 0x225   :  { %v360_v52 = vmul.f32 1.442695, %v359_v50  ;;  %v366_v54 = vmul.f32 1.442695, %v365_v51 }
 0x227   :  { %528 = vpow2.f32 %v360_v52 }
 0x228   :  { %530 = vpow2.f32 %v366_v54 }
 0x234   :  { %v529_v58 = vpop.eup %528 }
 0x235   :  { %v531_v59 = vpop.eup %530  ;;  %v362_v60 = vsel %vm351_vm12, %v529_v58, 0.0 }
 0x236   :  { %v368_v62 = vsel %vm351_vm12, %v531_v59, 0.0  ;;  %363 = vadd.xlane.f32.xlu0 %v362_v60 }
 0x237   :  { %369 = vadd.xlane.f32.xlu1 %v368_v62 }
 0x23a   :  { %348 = vadd.xlane.f32.xlu0 %v347_v53 }
 0x23b   :  { %449 = vadd.xlane.f32.xlu1 %v448_v56 }
 0x2bf   :  { %v364_v0 = vpop.xlane.xlu0 %363 }
 0x2c0   :  { %v370_v1 = vpop.xlane.xlu1 %369 }
 0x2c1   :  { %v371_v2 = vadd.f32 %v370_v1, %v364_v0 }
 0x2c3   :  { %532 = vlog2.f32 %v371_v2  ;;  %v349_v3 = vpop.xlane.xlu0 %348 }
 0x2c4   :  { %v350_v4 = vmul.f32 2.0, %v349_v3  ;;  %v450_v6 = vpop.xlane.xlu1 %449 }
 0x2c6   :  { %v376_v9 = vmul.f32 2.0, %v350_v4 }
 0x2d0   :  { %v533_v5 = vpop.eup %532 }
 0x2d1   :  { %v373_v7 = vmul.f32 0.6931472, %v533_v5 }
 0x2d3   :  { %v374_v8 = vadd.f32 %v373_v7, %v358_v49 }
 0x2d5   :  { %v377_v10 = vsub.f32 %v374_v8, %v376_v9 }
 0x2d7   :  { %v378_v43 = vrot.slane %v377_v10, 4 }
 0x2d9   :  { %v379_v11 = vadd.f32 %v378_v43, %v377_v10 }
 0x2db   :  { %v380_v12 = vrot.slane %v379_v11, 2 }
 0x2dd   :  { %v381_v13 = vadd.f32 %v380_v12, %v379_v11 }
 0x2df   :  { %v382_v14 = vrot.slane %v381_v13, 1 }
 0x2e1   :  { %v383_v16 = vadd.f32 %v382_v14, %v381_v13 }
 0x2e3   :  { %v384_v17 = vadd.f32 %v383_v16, %v375_v15 }
 0x2e5   :  { %386 = vst.msk [vmem:[#allocation2] sm:$0x1] %vm40_vm13, %v384_v17 }
 0x2ec   :  { %v447_v18 = vld [vmem:[#allocation2] sm:$0x1] }
 0x2ed   :  { %v451_v19 = vadd.f32 %v450_v6, %v447_v18 }
 0x2ef   :  { %v452_v20 = vmul.f32 0.0625, %v451_v19 }
 0x2f1   :  { %453 = vst.msk [vmem:[#allocation10] sm:$0x1] %vm40_vm13, %v452_v20 }
 0x2f2   :  { %585 = shalt.err (!%p582_p0)
}
 0x2f3   :  { %463 = dma.vmem_to_hbm [thread:$0]  %s461_s1, 16, %s692_s2, [#allocation7]  }
 0x2f4   :  { %598 = dma.done.wait [#allocation7], 16  }
 0x2f5   :  { %599 = vsyncadd [#allocation7], 4294967280 }
 0x2f6   :  { %467 = vsyncpa [#allocation6], 1 }
 0x2f7   :  { %468 = vsyncpa [#allocation9], 1 }
 0x2f8   :  { %469 = vsyncpa [#allocation7], 1 }

</bundles_post_ra>
